<compile_context>
chip_gen: v5e
topology: v5e:2x2
jax: 0.10.0
libtpu: 0.0.40
codegen_flags: <defaults>
</compile_context>

<pallas_src>
import functools

import jax
import jax.numpy as jnp
from jax.experimental import pallas as pl
from jax.experimental.pallas import tpu as pltpu


# ---------------------------------------------------------------------------
# Tiling helpers
# ---------------------------------------------------------------------------
def _pick_tiles(N, C, HW, budget_bytes=4 << 20):
    """Pick (TN, TM) so one (TN, C, TM) f32 block is ~budget_bytes and tiles evenly."""
    if HW % 128 == 0:
        cap = max(128, ((budget_bytes // (C * 4)) // 128) * 128)
        d = (min(cap, HW) // 128) * 128
        tm = 128
        while d >= 128:
            if HW % d == 0:
                tm = d
                break
            d -= 128
    else:
        # TODO(synk): HW with no multiple-of-128 tiling falls back to a full-row
        # block; a pathological huge odd HW could exceed the VMEM budget.
        tm = HW
    per_image = C * tm * 4
    tn_cap = max(1, int(budget_bytes // per_image))
    tn = 1
    for d in range(min(N, tn_cap), 0, -1):
        if N % d == 0:
            tn = d
            break
    return tn, tm


def _vmem_limit_bytes(block_bytes, n_streams):
    """Scoped-VMEM request: double-buffered streams + slack, capped for v7x (64 MiB phys)."""
    need = 2 * n_streams * block_bytes + (4 << 20)
    return int(min(max(need, 32 << 20), 48 << 20))


# ---------------------------------------------------------------------------
# Kernel 1: data-dependent initialization statistics (two-pass streaming).
# x3: (N, C, HW).  Grid (2, N//TN, HW//TM):
#   pass 0 accumulates sum(x)            -> bias = -mean
#   pass 1 accumulates sum((x + bias)^2) -> logs = log(scale/(sqrt(v)+eps)), scale=exp(logs)
# Accumulator is lane-partial (C, TM); cross-lane reduce only at finalize.
# ---------------------------------------------------------------------------
def _stats_kernel(x_ref, bias_ref, logs_ref, scale_ref, acc_ref, bias_sc,
                  *, inv_m, scale, eps):
    p = pl.program_id(0)
    n = pl.program_id(1)
    r = pl.program_id(2)
    is_first = jnp.logical_and(n == 0, r == 0)
    is_last = jnp.logical_and(n == pl.num_programs(1) - 1,
                              r == pl.num_programs(2) - 1)

    @pl.when(is_first)
    def _reset():
        acc_ref[...] = jnp.zeros_like(acc_ref)

    x = x_ref[...]                                   # (TN, C, TM) f32

    @pl.when(p == 0)
    def _acc_sum():
        acc_ref[...] += jnp.sum(x, axis=0)           # VALU adds only

    @pl.when(p == 1)
    def _acc_var():
        xc = x + bias_sc[...]                        # (C,1) broadcast
        acc_ref[...] += jnp.sum(xc * xc, axis=0)

    @pl.when(jnp.logical_and(p == 0, is_last))
    def _finalize_mean():
        mean = jnp.sum(acc_ref[...], axis=1, keepdims=True) * inv_m   # (C,1)
        bias_sc[...] = -mean
        bias_ref[...] = -mean

    @pl.when(jnp.logical_and(p == 1, is_last))
    def _finalize_var():
        v = jnp.sum(acc_ref[...], axis=1, keepdims=True) * inv_m      # (C,1)
        lg = jnp.log(scale / (jnp.sqrt(v) + eps))
        logs_ref[...] = lg
        scale_ref[...] = jnp.exp(lg)


def actnorm_init_stats(x3, *, scale=1.0, eps=1e-6, budget_bytes=4 << 20):
    N, C, HW = x3.shape
    tn, tm = _pick_tiles(N, C, HW, budget_bytes)
    gn, gr = N // tn, HW // tm
    block_bytes = tn * C * tm * 4
    kernel = functools.partial(
        _stats_kernel, inv_m=1.0 / float(N * HW), scale=float(scale), eps=float(eps)
    )
    return pl.pallas_call(
        kernel,
        out_shape=(
            jax.ShapeDtypeStruct((C, 1), jnp.float32),   # bias
            jax.ShapeDtypeStruct((C, 1), jnp.float32),   # logs
            jax.ShapeDtypeStruct((C, 1), jnp.float32),   # exp(logs)
        ),
        grid=(2, gn, gr),
        in_specs=[pl.BlockSpec((tn, C, tm), lambda p, n, r: (n, 0, r))],
        out_specs=(
            pl.BlockSpec((C, 1), lambda p, n, r: (0, 0)),
            pl.BlockSpec((C, 1), lambda p, n, r: (0, 0)),
            pl.BlockSpec((C, 1), lambda p, n, r: (0, 0)),
        ),
        scratch_shapes=[
            pltpu.VMEM((C, tm), jnp.float32),   # lane-partial running sum (reused per pass)
            pltpu.VMEM((C, 1), jnp.float32),    # bias carried from pass 0 to pass 1
        ],
        compiler_params=pltpu.CompilerParams(
            dimension_semantics=("arbitrary", "arbitrary", "arbitrary"),
            vmem_limit_bytes=_vmem_limit_bytes(block_bytes, 1),
        ),
    )(x3)


# ---------------------------------------------------------------------------
# Kernel 2: streaming elementwise transform  y = (x + bias) * scale.
# bias/scale are (C,1), VMEM-resident (constant index map); pure HBM streaming.
# ---------------------------------------------------------------------------
def _apply_kernel(x_ref, bias_ref, scale_ref, out_ref):
    out_ref[...] = (x_ref[...] + bias_ref[...]) * scale_ref[...]


def actnorm_apply(x3, bias_c, scale_c, *, budget_bytes=4 << 20):
    N, C, HW = x3.shape
    tn, tm = _pick_tiles(N, C, HW, budget_bytes)
    gn, gr = N // tn, HW // tm
    block_bytes = tn * C * tm * 4
    return pl.pallas_call(
        _apply_kernel,
        out_shape=jax.ShapeDtypeStruct((N, C, HW), jnp.float32),
        grid=(gn, gr),
        in_specs=[
            pl.BlockSpec((tn, C, tm), lambda n, r: (n, 0, r)),
            pl.BlockSpec((C, 1), lambda n, r: (0, 0)),
            pl.BlockSpec((C, 1), lambda n, r: (0, 0)),
        ],
        out_specs=pl.BlockSpec((tn, C, tm), lambda n, r: (n, 0, r)),
        compiler_params=pltpu.CompilerParams(
            dimension_semantics=("parallel", "parallel"),
            vmem_limit_bytes=_vmem_limit_bytes(block_bytes, 2),
        ),
    )(x3, bias_c, scale_c)


# ---------------------------------------------------------------------------
# Wrapper mirroring ActNorm.forward(x, ldj, reverse).
# ---------------------------------------------------------------------------
def actnorm_forward(x, ldj=None, *, bias=None, logs=None, is_initialized=False,
                    reverse=False, scale=1.0, eps=1e-6):
    """x: (N, C, H, W).  bias/logs: (1, C, 1, 1).  is_initialized is a static flag.

    Returns (out, ldj, bias_param, logs_param) with params shaped (1, C, 1, 1).
    """
    N, C, H, W = x.shape
    HW = H * W
    x3 = x.reshape(N, C, HW).astype(jnp.float32)   # free reshape, no HBM transpose

    if not is_initialized:
        # initialize_parameters(x): two-pass stats over dims [0, 2, 3]
        bias_c, logs_c, scale_c = actnorm_init_stats(x3, scale=scale, eps=eps)
    else:
        bias_c = bias.reshape(C, 1).astype(jnp.float32)
        logs_c = logs.reshape(C, 1).astype(jnp.float32)
        scale_c = jnp.exp(logs_c)                   # hoisted out of the kernel

    if reverse:
        # y = x*exp(-logs) - bias == (x + (-bias*exp(logs))) * exp(-logs)
        out3 = actnorm_apply(x3, -bias_c * scale_c, jnp.exp(-logs_c))
        if ldj is not None:
            ldj = ldj - jnp.sum(logs_c) * float(HW)
    else:
        out3 = actnorm_apply(x3, bias_c, scale_c)
        if ldj is not None:
            ldj = ldj + jnp.sum(logs_c) * float(HW)

    out = out3.reshape(N, C, H, W)
    return out, ldj, bias_c.reshape(1, C, 1, 1), logs_c.reshape(1, C, 1, 1)


if __name__ == "__main__":
    key = jax.random.PRNGKey(0)
    N, C, H, W = 2, 4, 16, 16
    x = jax.random.normal(key, (N, C, H, W), dtype=jnp.float32) * 2.0 + 0.5
    ldj0 = jnp.zeros((N,), dtype=jnp.float32)

    # Params as created in __init__ (zeros); is_initialized = False -> data-dependent init.
    bias_param = jnp.zeros((1, C, 1, 1), dtype=jnp.float32)
    logs_param = jnp.zeros((1, C, 1, 1), dtype=jnp.float32)

    out, ldj, bias_new, logs_new = actnorm_forward(
        x, ldj0, bias=bias_param, logs=logs_param, is_initialized=False,
        scale=1.0, eps=1e-6,
    )
    jax.block_until_ready((out, ldj, bias_new, logs_new))

    # Pure-JAX reference (matches the PyTorch module exactly).
    mean_ref = jnp.mean(x, axis=(0, 2, 3), keepdims=True)
    bias_ref = -mean_ref
    v_ref = jnp.mean((x + bias_ref) ** 2, axis=(0, 2, 3), keepdims=True)
    logs_ref = jnp.log(1.0 / (jnp.sqrt(v_ref) + 1e-6))
    out_ref = (x + bias_ref) * jnp.exp(logs_ref)
    ldj_ref = ldj0 + jnp.sum(logs_ref) * H * W

    assert jnp.allclose(out, out_ref, atol=1e-4, rtol=1e-4)
    assert jnp.allclose(ldj, ldj_ref, atol=1e-2, rtol=1e-3)
    assert jnp.allclose(bias_new, bias_ref, atol=1e-4, rtol=1e-4)
    assert jnp.allclose(logs_new, logs_ref, atol=1e-4, rtol=1e-4)

    # Already-initialized path (trainable-params forward).
    out2, ldj2, _, _ = actnorm_forward(
        x, ldj0, bias=bias_new, logs=logs_new, is_initialized=True,
        scale=1.0, eps=1e-6,
    )
    jax.block_until_ready((out2, ldj2))
    assert jnp.allclose(out2, out_ref, atol=1e-4, rtol=1e-4)

    # Reverse path round-trips back to x.
    back, ldj_back, _, _ = actnorm_forward(
        out, ldj, bias=bias_new, logs=logs_new, is_initialized=True,
        reverse=True, scale=1.0, eps=1e-6,
    )
    jax.block_until_ready((back, ldj_back))
    assert jnp.allclose(back, x, atol=1e-3, rtol=1e-3)
    assert jnp.allclose(ldj_back, ldj0, atol=1e-2, rtol=1e-3)

    print("KERNEL_OK")
</pallas_src>

<mosaic_0001>
module attributes {stable_mosaic.version = 11 : i64} {
  func.func @_stats_kernel(%arg0: i32, %arg1: i32, %arg2: i32, %arg3: memref<2x4x256xf32, #tpu.memory_space<vmem>>, %arg4: memref<4x1xf32, #tpu.memory_space<vmem>>, %arg5: memref<4x1xf32, #tpu.memory_space<vmem>>, %arg6: memref<4x1xf32, #tpu.memory_space<vmem>>, %arg7: memref<4x256xf32, #tpu.memory_space<vmem>>, %arg8: memref<4x1xf32, #tpu.memory_space<vmem>>) attributes {dimension_semantics = [#tpu.dimension_semantics<arbitrary>, #tpu.dimension_semantics<arbitrary>, #tpu.dimension_semantics<arbitrary>], iteration_bounds = array<i64: 2, 1, 1>, scalar_prefetch = 0 : i64, scratch_operands = 2 : i64, tpu.core_type = #tpu.core_type<tc>, window_params = [{transform_indices = @transform_0, window_bounds = array<i64: 2, 4, 256>}, {pipeline_mode = #tpu.pipeline_mode<synchronous>, transform_indices = @transform_1, window_bounds = array<i64: 4, 1>}, {pipeline_mode = #tpu.pipeline_mode<synchronous>, transform_indices = @transform_2, window_bounds = array<i64: 4, 1>}, {pipeline_mode = #tpu.pipeline_mode<synchronous>, transform_indices = @transform_3, window_bounds = array<i64: 4, 1>}]} {
    %c0_i32 = arith.constant 0 : i32
    %0 = arith.cmpi eq, %arg1, %c0_i32 : i32
    %c0_i32_0 = arith.constant 0 : i32
    %1 = arith.cmpi eq, %arg2, %c0_i32_0 : i32
    %2 = arith.andi %0, %1 : i1
    %c0_i32_1 = arith.constant 0 : i32
    %3 = arith.cmpi eq, %arg1, %c0_i32_1 : i32
    %c0_i32_2 = arith.constant 0 : i32
    %4 = arith.cmpi eq, %arg2, %c0_i32_2 : i32
    %5 = arith.andi %3, %4 : i1
    %6 = arith.extui %2 : i1 to i32
    %c0_i32_3 = arith.constant 0 : i32
    %7 = arith.cmpi ne, %6, %c0_i32_3 : i32
    scf.if %7 {
      %cst = arith.constant 0.000000e+00 : f32
      %23 = vector.broadcast %cst : f32 to vector<4x256xf32>
      %c0_13 = arith.constant 0 : index
      %c0_14 = arith.constant 0 : index
      %24 = vector.load %arg7[%c0_13, %c0_14] : memref<4x256xf32, #tpu.memory_space<vmem>>, vector<4x256xf32>
      tpu.vector_store %arg7[%c0_13, %c0_14], %23 {strides = array<i32>} : memref<4x256xf32, #tpu.memory_space<vmem>>, vector<4x256xf32>,
    } else {
    }
    %c0 = arith.constant 0 : index
    %c0_4 = arith.constant 0 : index
    %c0_5 = arith.constant 0 : index
    %8 = vector.load %arg3[%c0, %c0_4, %c0_5] : memref<2x4x256xf32, #tpu.memory_space<vmem>>, vector<2x4x256xf32>
    %c0_i32_6 = arith.constant 0 : i32
    %9 = arith.cmpi eq, %arg0, %c0_i32_6 : i32
    %10 = arith.extui %9 : i1 to i32
    %c0_i32_7 = arith.constant 0 : i32
    %11 = arith.cmpi ne, %10, %c0_i32_7 : i32
    scf.if %11 {
      %c0_13 = arith.constant 0 : index
      %c0_14 = arith.constant 0 : index
      %23 = vector.load %arg7[%c0_13, %c0_14] : memref<4x256xf32, #tpu.memory_space<vmem>>, vector<4x256xf32>
      %cst = arith.constant dense<0.000000e+00> : vector<4x256xf32>
      %24 = vector.multi_reduction <add>, %8, %cst [0] : vector<2x4x256xf32> to vector<4x256xf32>
      %25 = arith.addf %23, %24 : vector<4x256xf32>
      %c0_15 = arith.constant 0 : index
      %c0_16 = arith.constant 0 : index
      %26 = vector.load %arg7[%c0_15, %c0_16] : memref<4x256xf32, #tpu.memory_space<vmem>>, vector<4x256xf32>
      tpu.vector_store %arg7[%c0_15, %c0_16], %25 {strides = array<i32>} : memref<4x256xf32, #tpu.memory_space<vmem>>, vector<4x256xf32>,
    } else {
    }
    %c1_i32 = arith.constant 1 : i32
    %12 = arith.cmpi eq, %arg0, %c1_i32 : i32
    %13 = arith.extui %12 : i1 to i32
    %c0_i32_8 = arith.constant 0 : i32
    %14 = arith.cmpi ne, %13, %c0_i32_8 : i32
    scf.if %14 {
      %c0_13 = arith.constant 0 : index
      %c0_14 = arith.constant 0 : index
      %23 = vector.load %arg8[%c0_13, %c0_14] : memref<4x1xf32, #tpu.memory_space<vmem>>, vector<4x1xf32>
      %24 = vector.shape_cast %23 : vector<4x1xf32> to vector<1x4x1xf32>
      %25 = vector.broadcast %24 : vector<1x4x1xf32> to vector<2x4x256xf32>
      %26 = arith.addf %8, %25 : vector<2x4x256xf32>
      %c0_15 = arith.constant 0 : index
      %c0_16 = arith.constant 0 : index
      %27 = vector.load %arg7[%c0_15, %c0_16] : memref<4x256xf32, #tpu.memory_space<vmem>>, vector<4x256xf32>
      %28 = arith.mulf %26, %26 : vector<2x4x256xf32>
      %cst = arith.constant dense<0.000000e+00> : vector<4x256xf32>
      %29 = vector.multi_reduction <add>, %28, %cst [0] : vector<2x4x256xf32> to vector<4x256xf32>
      %30 = arith.addf %27, %29 : vector<4x256xf32>
      %c0_17 = arith.constant 0 : index
      %c0_18 = arith.constant 0 : index
      %31 = vector.load %arg7[%c0_17, %c0_18] : memref<4x256xf32, #tpu.memory_space<vmem>>, vector<4x256xf32>
      tpu.vector_store %arg7[%c0_17, %c0_18], %30 {strides = array<i32>} : memref<4x256xf32, #tpu.memory_space<vmem>>, vector<4x256xf32>,
    } else {
    }
    %c0_i32_9 = arith.constant 0 : i32
    %15 = arith.cmpi eq, %arg0, %c0_i32_9 : i32
    %16 = arith.andi %15, %5 : i1
    %17 = arith.extui %16 : i1 to i32
    %c0_i32_10 = arith.constant 0 : i32
    %18 = arith.cmpi ne, %17, %c0_i32_10 : i32
    scf.if %18 {
      %c0_13 = arith.constant 0 : index
      %c0_14 = arith.constant 0 : index
      %23 = vector.load %arg7[%c0_13, %c0_14] : memref<4x256xf32, #tpu.memory_space<vmem>>, vector<4x256xf32>
      %cst = arith.constant dense<0.000000e+00> : vector<4xf32>
      %24 = vector.multi_reduction <add>, %23, %cst [1] : vector<4x256xf32> to vector<4xf32>
      %25 = vector.shape_cast %24 : vector<4xf32> to vector<4x1xf32>
      %cst_15 = arith.constant 0.001953125 : f32
      %26 = vector.broadcast %cst_15 : f32 to vector<4x1xf32>
      %27 = arith.mulf %25, %26 : vector<4x1xf32>
      %cst_16 = arith.constant 0.000000e+00 : f32
      %28 = vector.broadcast %cst_16 : f32 to vector<4x1xf32>
      %29 = arith.subf %28, %27 : vector<4x1xf32>
      %c0_17 = arith.constant 0 : index
      %c0_18 = arith.constant 0 : index
      %30 = vector.load %arg8[%c0_17, %c0_18] : memref<4x1xf32, #tpu.memory_space<vmem>>, vector<4x1xf32>
      tpu.vector_store %arg8[%c0_17, %c0_18], %29 {strides = array<i32>} : memref<4x1xf32, #tpu.memory_space<vmem>>, vector<4x1xf32>,
      %cst_19 = arith.constant 0.000000e+00 : f32
      %31 = vector.broadcast %cst_19 : f32 to vector<4x1xf32>
      %32 = arith.subf %31, %27 : vector<4x1xf32>
      %c0_20 = arith.constant 0 : index
      %c0_21 = arith.constant 0 : index
      %33 = vector.load %arg4[%c0_20, %c0_21] : memref<4x1xf32, #tpu.memory_space<vmem>>, vector<4x1xf32>
      tpu.vector_store %arg4[%c0_20, %c0_21], %32 {strides = array<i32>} : memref<4x1xf32, #tpu.memory_space<vmem>>, vector<4x1xf32>,
    } else {
    }
    %c1_i32_11 = arith.constant 1 : i32
    %19 = arith.cmpi eq, %arg0, %c1_i32_11 : i32
    %20 = arith.andi %19, %5 : i1
    %21 = arith.extui %20 : i1 to i32
    %c0_i32_12 = arith.constant 0 : i32
    %22 = arith.cmpi ne, %21, %c0_i32_12 : i32
    scf.if %22 {
      %c0_13 = arith.constant 0 : index
      %c0_14 = arith.constant 0 : index
      %23 = vector.load %arg7[%c0_13, %c0_14] : memref<4x256xf32, #tpu.memory_space<vmem>>, vector<4x256xf32>
      %cst = arith.constant dense<0.000000e+00> : vector<4xf32>
      %24 = vector.multi_reduction <add>, %23, %cst [1] : vector<4x256xf32> to vector<4xf32>
      %25 = vector.shape_cast %24 : vector<4xf32> to vector<4x1xf32>
      %cst_15 = arith.constant 0.001953125 : f32
      %26 = vector.broadcast %cst_15 : f32 to vector<4x1xf32>
      %27 = arith.mulf %25, %26 : vector<4x1xf32>
      %28 = math.sqrt %27 : vector<4x1xf32>
      %cst_16 = arith.constant 9.99999997E-7 : f32
      %29 = vector.broadcast %cst_16 : f32 to vector<4x1xf32>
      %30 = arith.addf %28, %29 : vector<4x1xf32>
      %cst_17 = arith.constant 1.000000e+00 : f32
      %31 = vector.broadcast %cst_17 : f32 to vector<4x1xf32>
      %32 = arith.divf %31, %30 : vector<4x1xf32>
      %33 = math.log %32 : vector<4x1xf32>
      %c0_18 = arith.constant 0 : index
      %c0_19 = arith.constant 0 : index
      %34 = vector.load %arg5[%c0_18, %c0_19] : memref<4x1xf32, #tpu.memory_space<vmem>>, vector<4x1xf32>
      tpu.vector_store %arg5[%c0_18, %c0_19], %33 {strides = array<i32>} : memref<4x1xf32, #tpu.memory_space<vmem>>, vector<4x1xf32>,
      %35 = math.exp %33 : vector<4x1xf32>
      %c0_20 = arith.constant 0 : index
      %c0_21 = arith.constant 0 : index
      %36 = vector.load %arg6[%c0_20, %c0_21] : memref<4x1xf32, #tpu.memory_space<vmem>>, vector<4x1xf32>
      tpu.vector_store %arg6[%c0_20, %c0_21], %35 {strides = array<i32>} : memref<4x1xf32, #tpu.memory_space<vmem>>, vector<4x1xf32>,
    } else {
    }
    return
  }
  func.func @transform_0(%arg0: i32, %arg1: i32, %arg2: i32) -> (i32, i32, i32) {
    %c0_i32 = arith.constant 0 : i32
    %c0_i32_0 = arith.constant 0 : i32
    return %arg1, %c0_i32, %arg2 : i32, i32, i32
  }
  func.func @transform_1(%arg0: i32, %arg1: i32, %arg2: i32) -> (i32, i32) {
    %c0_i32 = arith.constant 0 : i32
    %c0_i32_0 = arith.constant 0 : i32
    %c0_i32_1 = arith.constant 0 : i32
    return %c0_i32, %c0_i32_0 : i32, i32
  }
  func.func @transform_2(%arg0: i32, %arg1: i32, %arg2: i32) -> (i32, i32) {
    %c0_i32 = arith.constant 0 : i32
    %c0_i32_0 = arith.constant 0 : i32
    %c0_i32_1 = arith.constant 0 : i32
    return %c0_i32, %c0_i32_0 : i32, i32
  }
  func.func @transform_3(%arg0: i32, %arg1: i32, %arg2: i32) -> (i32, i32) {
    %c0_i32 = arith.constant 0 : i32
    %c0_i32_0 = arith.constant 0 : i32
    %c0_i32_1 = arith.constant 0 : i32
    return %c0_i32, %c0_i32_0 : i32, i32
  }
}

</mosaic_0001>

<bundles_post_ra>
// kernel: tpu_custom_call.1
= control target key start
LH: loop header
LB: loop body
LE: loop exit
PB: predicated region body
PF: predicated region fallthrough
CT: control target
= control target key end

     0   :  { %9 = vsyncpa [#allocation5], 0  ;;  %s547_s12 = smov 0   ;;  %s549_s13 = smov 0   ;;  %s597_s0 = inlined_call_operand.hbm [shape: f32[2,4,256], index: 0, kind: input, shape index: {}]   ;;  %s598_s1 = inlined_call_operand.vmem [shape: f32[4,1], index: 1, kind: output, shape index: {0}]   ;;  %s599_s2 = inlined_call_operand.vmem [shape: f32[4,1], index: 2, kind: output, shape index: {1}]   ;;  %s600_s3 = inlined_call_operand.vmem [shape: f32[4,1], index: 3, kind: output, shape index: {2}]  }
   0x1   :  { %s551_s14 = smov 0  }
   0x2 LB: > { %s401_s15 = sadd.s32 4294967295, %s519_s14   ;;  %s34_s16 = sadd.s32 1, %s515_s13  ;;  %s519_s14 = sphi %s551_s14, %s15_s14   ;;  %s515_s13 = sphi %s549_s13, %s602_s13   ;;  %s511_s12 = sphi %s547_s12, %s601_s12  }
   0x3   : > { %p36_p0 = scmp.ge.s32.totalorder %s34_s16, 2  ;;  %p402_p1 = scmp.ge.s32.totalorder %s519_s14, 1 }
   0x4   : > { %p130_p2 = scmp.lt.s32.totalorder %s519_s14, 3  ;;  %p422_p4 = scmp.eq.s32.totalorder %s401_s15, 0 }
   0x5   : > { %s604_s16 = smov (%p36_p0, %s34_s16), 0  ;;  %s147_s19 = sshll.u32 %s597_s0, 4  ;;  %s148_s19 = int_to_ptr.hbm [resolvable:$true] %s147_s19 }
   0x6   : > { %p131_p3 = pnand %p402_p1, %p130_p2  ;;  %s521_s20 = smov [#allocation4]  }
   0x7   : > { %s149_s21 = sshll.u32 %s521_s20, 4  ;;  %s522_s22 = smov 128   ;;  %s150_s21 = int_to_ptr.vmem [resolvable:$true] %s149_s21 }
   0x8   : > { %p418_p5 = pneg %p131_p3  ;;  %s523_s23 = smov 8  }
   0x9   : > { %165 = sbr.rel (%p131_p3) target bundleno = 519 (0x207), region = 24 }
   0xa   : > { %p419_p6 = pnand %p422_p4, %p418_p5 }
   0xc   : > { %421 = dma.hbm_to_vmem [thread:$0]  (!%p419_p6), %s148_s19, 256, %s150_s21, [#allocation5], %s522_s22, %s522_s22, %s523_s23  }
   0xe   : > { %506 = dma.done.wait (%p422_p4), [#allocation5], 256  }
   0xf   : > { %508 = vsyncadd (%p422_p4), [#allocation5], 4294967040  ;;  %p191_p7 = scmp.eq.s32.totalorder %s511_s12, 0  ;;  %v524_v0 = vmov 0.0   ;;  %v189_v1 = vld [vmem:[#allocation4] sm:$0xff]  ;;  %v190_v2 = vld [vmem:[#allocation4 + $0x8] sm:$0xff] }
  0x10   : > { %188 = vst [vmem:[#allocation2] sm:$0xff] %v524_v0  ;;  %p406_p8 = scmp.ne.s32.totalorder %s511_s12, 0 }
  0x12   : > { %194 = sbr.rel (%p406_p8) target bundleno = 41 (0x29), region = 36 }
  0x17   : > { %198 = vst [vmem:[#allocation1] ss:$2 sm:$0xff] %v189_v1  ;;  %vm209_vm0 = vcmask 1043456   ;;  %v195_v12 = vld [vmem:[#allocation2] sm:$0xff] }
  0x18   : > { %202 = vst [vmem:[#allocation1 + $0x10] ss:$2 sm:$0xff] %v190_v2 }
  0x1e   : > { %v199_v3 = vld.sshfl [vmem:[#allocation1] sm:$0xff pattern:$0x75316420]  ;;  %v200_v4 = vld.sshfl [vmem:[#allocation1 + $0x8] sm:$0xff pattern:$0x75316420] }
  0x1f   : > { %v203_v5 = vld.sshfl [vmem:[#allocation1 + $0x10] sm:$0xff pattern:$0x75316420]  ;;  %v204_v6 = vld.sshfl [vmem:[#allocation1 + $0x18] sm:$0xff pattern:$0x75316420] }
  0x20   : > { %v210_v7 = vsel %vm209_vm0, %v199_v3, 0.0  ;;  %v211_v8 = vsel %vm209_vm0, %v203_v5, 0.0  ;;  %v213_v9 = vsel %vm209_vm0, %v200_v4, 0.0  ;;  %v214_v10 = vsel %vm209_vm0, %v204_v6, 0.0 }
  0x21   : > { %v215_v11 = vadd.f32 %v214_v10, %v213_v9  ;;  %v212_v13 = vadd.f32 %v211_v8, %v210_v7 }
  0x23   : > { %v218_v14 = vrot.slane %v215_v11, 4 }
  0x25   : > { %v219_v15 = vsel %vm209_vm0, %v212_v13, %v218_v14 }
  0x26   : > { %v221_v16 = vadd.f32 %v219_v15, %v195_v12 }
  0x28   : > { %222 = vst [vmem:[#allocation2] sm:$0xff] %v221_v16 }
  0x29 PF: > { %p223_p9 = scmp.eq.s32.totalorder %s511_s12, 1  ;;  %p407_p10 = scmp.ne.s32.totalorder %s511_s12, 1 }
  0x2b   : > { %226 = sbr.rel (%p407_p10) target bundleno = 189 (0xbd), region = 40 }
  0x30   : > { %v227_v17 = vld [vmem:[#allocation3] sm:$0xf]  ;;  %v525_v18 = vmov 0   ;;  %v526_v19 = vmov 839922192   ;;  %vm255_vm1 = vcmask 1043456  }
  0x31   : > { %454 = vset.pattern.permute.xlu0 %v525_v18  ;;  %v233_v20 = vunpack.c.l.s4 %v526_v19  ;;  %v239_v37 = vld [vmem:[#allocation2] sm:$0xff] }
  0x32   : > { %230 = vperm.xlu0 %454, %v227_v17  }
  0x33   : > { %v234_v21 = vunpack.c.0.s8 %v233_v20 }
  0xa4   : > { %v231_v22 = vpop.permute.xlu0 %230 }
  0xa5   : > { %v235_v23 = vperm.slane %v231_v22, %v234_v21 }
  0xa7   : > { %v237_v24 = vadd.f32 %v235_v23, %v189_v1  ;;  %v238_v25 = vadd.f32 %v235_v23, %v190_v2 }
  0xa9   : > { %v240_v26 = vmul.f32 %v237_v24, %v237_v24  ;;  %v241_v27 = vmul.f32 %v238_v25, %v238_v25 }
  0xab   : > { %244 = vst [vmem:[#allocation1] ss:$2 sm:$0xff] %v240_v26 }
  0xac   : > { %248 = vst [vmem:[#allocation1 + $0x10] ss:$2 sm:$0xff] %v241_v27 }
  0xb2   : > { %v245_v28 = vld.sshfl [vmem:[#allocation1] sm:$0xff pattern:$0x75316420]  ;;  %v246_v29 = vld.sshfl [vmem:[#allocation1 + $0x8] sm:$0xff pattern:$0x75316420] }
  0xb3   : > { %v249_v30 = vld.sshfl [vmem:[#allocation1 + $0x10] sm:$0xff pattern:$0x75316420]  ;;  %v250_v31 = vld.sshfl [vmem:[#allocation1 + $0x18] sm:$0xff pattern:$0x75316420] }
  0xb4   : > { %v256_v32 = vsel %vm255_vm1, %v245_v28, 0.0  ;;  %v257_v33 = vsel %vm255_vm1, %v249_v30, 0.0  ;;  %v259_v34 = vsel %vm255_vm1, %v246_v29, 0.0  ;;  %v260_v35 = vsel %vm255_vm1, %v250_v31, 0.0 }
  0xb5   : > { %v261_v36 = vadd.f32 %v260_v35, %v259_v34  ;;  %v258_v38 = vadd.f32 %v257_v33, %v256_v32 }
  0xb7   : > { %v264_v39 = vrot.slane %v261_v36, 4 }
  0xb9   : > { %v265_v40 = vsel %vm255_vm1, %v258_v38, %v264_v39 }
  0xba   : > { %v267_v41 = vadd.f32 %v265_v40, %v239_v37 }
  0xbc   : > { %268 = vst [vmem:[#allocation2] sm:$0xff] %v267_v41 }
  0xbd PF: > { %272 = sbr.rel (!%p191_p7) target bundleno = 329 (0x149), region = 44  ;;  %vm280_vm2 = vcmask (%p191_p7), 1043456   ;;  %vm288_vm3 = vcmask (%p191_p7), 3072  }
  0xc3   : > { %v273_v42 = vld [vmem:[#allocation2] sm:$0xff] }
  0xc4   : > { %275 = vst [vmem:[#allocation1] ss:$2 sm:$0xff] %v273_v42 }
  0xcb   : > { %v276_v43 = vld.sshfl [vmem:[#allocation1] sm:$0xff pattern:$0x75316420]  ;;  %v277_v44 = vld.sshfl [vmem:[#allocation1 + $0x8] sm:$0xff pattern:$0x75316420] }
  0xcc   : > { %v281_v45 = vsel %vm280_vm2, %v276_v43, 0.0  ;;  %v282_v46 = vsel %vm280_vm2, %v277_v44, 0.0 }
  0xcd   : > { %v283_v47 = vadd.f32 %v282_v46, %v281_v45 }
  0xcf   : > { %284 = vadd.xlane.f32.xlu0 %v283_v47 }
 0x142   : > { %v285_v48 = vpop.xlane.xlu0 %284 }
 0x143   : > { %v286_v49 = vmul.f32 0.001953125, %v285_v48 }
 0x145   : > { %v287_v50 = vsub.f32 0.0, %v286_v49 }
 0x147   : > { %289 = vst.msk [vmem:[#allocation3] sm:$0xf] %vm288_vm3, %v287_v50 }
 0x148   : > { %290 = vst.msk [vmem:[%s598_s1] sm:$0xf] %vm288_vm3, %v287_v50 }
 0x149 PF: > { %294 = sbr.rel (!%p223_p9) target bundleno = 519 (0x207), region = 48  ;;  %vm302_vm4 = vcmask (%p223_p9), 1043456   ;;  %vm339_vm11 = vcmask (%p223_p9), 3072  }
 0x14a   : > { %v295_v51 = vld [vmem:[#allocation2] sm:$0xff] (%p223_p9) }
 0x14b   : > { %297 = vst [vmem:[#allocation1] ss:$2 sm:$0xff] (%p223_p9), %v295_v51 }
 0x152   : > { %v298_v52 = vld.sshfl [vmem:[#allocation1] sm:$0xff pattern:$0x75316420]  ;;  %v299_v53 = vld.sshfl [vmem:[#allocation1 + $0x8] sm:$0xff pattern:$0x75316420] }
 0x153   : > { %v303_v54 = vsel %vm302_vm4, %v298_v52, 0.0  ;;  %v304_v55 = vsel %vm302_vm4, %v299_v53, 0.0 }
 0x154   : > { %v305_v56 = vadd.f32 %v304_v55, %v303_v54 }
 0x156   : > { %306 = vadd.xlane.f32.xlu0 %v305_v56 }
 0x1c9   : > { %v307_v57 = vpop.xlane.xlu0 %306 }
 0x1ca   : > { %v308_v58 = vmul.f32 0.001953125, %v307_v57 }
 0x1cc   : > { %455 = vrsqrt.f32 %v308_v58  ;;  %vm316_vm5 = vcmp.eq.f32.partialorder %v308_v58, inf  ;;  %v319_v2 = vand.u32 2147483648, %v308_v58  ;;  %vm318_vm6 = vcmp.eq.f32.partialorder %v308_v58, 0.0 }
 0x1d2   : > { %v456_v59 = vpop.eup %455 }
 0x1d3   : > { %v310_v60 = vmul.f32 %v456_v59, %v308_v58 }
 0x1d5   : > { %v311_v61 = vmul.f32 %v456_v59, %v310_v60 }
 0x1d7   : > { %v312_v62 = vmul.f32 0.5, %v311_v61 }
 0x1d9   : > { %v313_v63 = vsub.f32 1.5, %v312_v62 }
 0x1db   : > { %v314_v0 = vmul.f32 %v456_v59, %v313_v63 }
 0x1dd   : > { %v315_v1 = vmul.f32 %v314_v0, %v308_v58 }
 0x1df   : > { %v317_v3 = vsel %vm316_vm5, %v308_v58, %v315_v1 }
 0x1e0   : > { %v320_v4 = vsel %vm318_vm6, %v319_v2, %v317_v3 }
 0x1e1   : > { %v321_v5 = vadd.f32 1e-06, %v320_v4 }
 0x1e3   : > { %457 = vrcp.f32 %v321_v5  ;;  %v333_v9 = vand.u32 2147483648, %v321_v5  ;;  %v331_v11 = vand.u32 2147483647, %v321_v5  ;;  %vm327_vm8 = vweird.f32 %v321_v5 }
 0x1e5   : > { %v334_v13 = vor.u32 1.1754944e-38, %v333_v9  ;;  %vm332_vm10 = vcmp.eq.f32.partialorder %v331_v11, 8.507059e+37 }
 0x1e9   : > { %v458_v6 = vpop.eup %457 }
 0x1ea   : > { %v323_v7 = vmul.f32 %v458_v6, %v321_v5  ;;  %vm328_vm7 = vweird.f32 %v458_v6 }
 0x1eb   : > { %vm329_vm9 = vmor %vm327_vm8, %vm328_vm7 }
 0x1ec   : > { %v324_v8 = vsub.f32 1.0, %v323_v7 }
 0x1ee   : > { %v325_v10 = vmul.f32 %v458_v6, %v324_v8 }
 0x1f0   : > { %v326_v12 = vadd.f32 %v458_v6, %v325_v10 }
 0x1f2   : > { %v330_v14 = vsel %vm329_vm9, %v458_v6, %v326_v12 }
 0x1f3   : > { %v335_v15 = vsel %vm332_vm10, %v334_v13, %v330_v14 }
 0x1f4   : > { %459 = vlog2.f32 %v335_v15 }
 0x1fa   : > { %v460_v16 = vpop.eup %459 }
 0x1fb   : > { %v338_v17 = vmul.f32 0.6931472, %v460_v16 }
 0x1fd   : > { %340 = vst.msk [vmem:[%s599_s2] sm:$0xf] %vm339_vm11, %v338_v17  ;;  %v341_v18 = vmul.f32 1.442695, %v338_v17 }
 0x1ff   : > { %461 = vpow2.f32 %v341_v18 }
 0x205   : > { %v462_v19 = vpop.eup %461 }
 0x206   : > { %343 = vst.msk [vmem:[%s600_s3] sm:$0xf] %vm339_vm11, %v462_v19 }
 0x207 PF: > { %s15_s14 = sadd.s32 1, %s519_s14   ;;  %s601_s12 = smov %s515_s13 }
 0x208   : > { %p12_p11 = scmp.ge.s32.totalorder %s15_s14, 4   ;;  %s602_s13 = smov %s604_s16 }
 0x20a   :  { %14 = sbr.rel (!%p12_p11) target bundleno = 2 (0x2), region = 91 }
 0x20f   :  { %367 = vsyncpa [#allocation5], 1 }
 0x210   :  { %369 = vsyncpa [#allocation5 + $0x1], 1 }

</bundles_post_ra>
